<compile_context>
chip_gen: v6e
topology: v6e:2x2x1
jax: 0.10.0
libtpu: 0.0.40
codegen_flags: <defaults>
</compile_context>

<pallas_src>
import functools

import jax
import jax.numpy as jnp
from jax import lax
from jax.experimental import pallas as pl
from jax.experimental.pallas import tpu as pltpu  # noqa: F401


def _conv_pool_relu_kernel(x_ref, w_ref, b_ref, o_ref, *, h, w):
    # x_ref: (N, Cin, H*W)  raw input, lane-dense flattened spatial axis
    # w_ref: (9*Cin, Cout)  conv weights, row order (ky, kx, cin), UNscaled
    # b_ref: (1, Cout)      conv bias
    # o_ref: (N, Cout)      pooled + ReLU output (single store)
    x = x_ref[...]
    n, cin, hw = x.shape

    # ---- zero-padded window sums via inclusion-exclusion --------------------
    # Tap (ky, kx): ky==0 drops the last input row, ky==2 drops the first row
    # (the padded row contributes zero); same for kx with columns.
    col = lax.broadcasted_iota(jnp.int32, (1, 1, hw), 2) % w

    total   = jnp.sum(x, axis=-1)                                   # (N, Cin)
    r_first = jnp.sum(x[:, :, :w], axis=-1)                         # row 0
    r_last  = jnp.sum(x[:, :, hw - w:], axis=-1)                    # row H-1
    c_first = jnp.sum(jnp.where(col == 0, x, 0.0), axis=-1)         # col 0
    c_last  = jnp.sum(jnp.where(col == w - 1, x, 0.0), axis=-1)     # col W-1

    x00 = x[:, :, 0]           # (0, 0)
    x0w = x[:, :, w - 1]       # (0, W-1)
    xh0 = x[:, :, hw - w]      # (H-1, 0)
    xhw = x[:, :, hw - 1]      # (H-1, W-1)

    taps = (
        total - r_last - c_last + xhw,     # ky=0, kx=0
        total - r_last,                    # ky=0, kx=1
        total - r_last - c_first + xh0,    # ky=0, kx=2
        total - c_last,                    # ky=1, kx=0
        total,                             # ky=1, kx=1
        total - c_first,                   # ky=1, kx=2
        total - r_first - c_last + x0w,    # ky=2, kx=0
        total - r_first,                   # ky=2, kx=1
        total - r_first - c_first + x00,   # ky=2, kx=2
    )

    # ---- contraction: 9 independent small MXU dots --------------------------
    wmat = w_ref[...]                                          # (9*Cin, Cout)
    partials = [
        jnp.dot(taps[t], wmat[t * cin:(t + 1) * cin, :],
                preferred_element_type=jnp.float32)            # (N, Cout)
        for t in range(9)
    ]
    # Tree-sum the independent partials (no long serial dependence chain).
    while len(partials) > 1:
        nxt = [partials[i] + partials[i + 1]
               for i in range(0, len(partials) - 1, 2)]
        if len(partials) % 2:
            nxt.append(partials[-1])
        partials = nxt
    acc = partials[0]

    # mean over H*W (scale applies to the conv sum only, NOT the bias), ReLU.
    inv_hw = 1.0 / float(h * w)
    o_ref[...] = jnp.maximum(acc * inv_hw + b_ref[...], 0.0)


def conv_pool_relu(x, weight, bias):
    """x: (N, Cin, H, W) f32, weight: (Cout, Cin, 3, 3) f32, bias: (Cout,) f32."""
    N, Cin, H, W = x.shape
    Cout = weight.shape[0]

    # Free, contiguous reshape -> lane-dense activation layout.
    x_flat = x.reshape(N, Cin, H * W)
    # Parameter-only reshuffle (9*Cin*Cout floats), row order (ky, kx, cin).
    w_mat = weight.transpose(2, 3, 1, 0).reshape(9 * Cin, Cout).astype(jnp.float32)
    b_mat = bias.reshape(1, Cout).astype(jnp.float32)

    kernel = functools.partial(_conv_pool_relu_kernel, h=H, w=W)
    out = pl.pallas_call(
        kernel,
        out_shape=jax.ShapeDtypeStruct((N, Cout), jnp.float32),
    )(x_flat, w_mat, b_mat)

    # Match PyTorch output shape (N, Cout, 1, 1).
    return out.reshape(N, Cout, 1, 1)


def _reference(x, weight, bias):
    conv = jax.lax.conv_general_dilated(
        x, weight, window_strides=(1, 1), padding=((1, 1), (1, 1)),
        dimension_numbers=("NCHW", "OIHW", "NCHW"))
    conv = conv + bias.reshape(1, -1, 1, 1)
    pooled = jnp.mean(conv, axis=(2, 3), keepdims=True)
    return jnp.maximum(pooled, 0.0)


if __name__ == "__main__":
    key = jax.random.PRNGKey(0)
    k_x, k_w, k_b = jax.random.split(key, 3)

    # Small shapes consistent with the module: N=2, Cin=3, H=W=16, Cout=8.
    N, Cin, H, W, Cout = 2, 3, 16, 16, 8
    x = jax.random.normal(k_x, (N, Cin, H, W), dtype=jnp.float32)

    # Deterministic parameter init (Conv2d(3, 8, 3) shapes).
    fan_in = Cin * 3 * 3
    bound = 1.0 / (fan_in ** 0.5)
    weight = jax.random.uniform(k_w, (Cout, Cin, 3, 3), jnp.float32, -bound, bound)
    bias = jax.random.uniform(k_b, (Cout,), jnp.float32, -bound, bound)

    out = jax.block_until_ready(conv_pool_relu(x, weight, bias))
    ref = jax.block_until_ready(_reference(x, weight, bias))

    assert out.shape == (N, Cout, 1, 1)
    assert jnp.allclose(out, ref, atol=1e-5, rtol=1e-4), (
        f"max abs err = {jnp.max(jnp.abs(out - ref))}")

    print("KERNEL_OK")
</pallas_src>

<mosaic_0001>
module attributes {stable_mosaic.version = 11 : i64} {
  func.func @_conv_pool_relu_kernel(%arg0: memref<2x3x256xf32, #tpu.memory_space<vmem>>, %arg1: memref<27x8xf32, #tpu.memory_space<vmem>>, %arg2: memref<1x8xf32, #tpu.memory_space<vmem>>, %arg3: memref<2x8xf32, #tpu.memory_space<vmem>>) attributes {dimension_semantics = [], scalar_prefetch = 0 : i64, scratch_operands = 0 : i64, tpu.core_type = #tpu.core_type<tc>} {
    %c0 = arith.constant 0 : index
    %c0_0 = arith.constant 0 : index
    %c0_1 = arith.constant 0 : index
    %0 = vector.load %arg0[%c0, %c0_0, %c0_1] : memref<2x3x256xf32, #tpu.memory_space<vmem>>, vector<2x3x256xf32>
    %1 = tpu.iota {dimensions = array<i32: 2>} : vector<1x1x256xi32>
    %c16_i32 = arith.constant 16 : i32
    %c0_i32 = arith.constant 0 : i32
    %2 = arith.cmpi eq, %c16_i32, %c0_i32 : i32
    %c1_i32 = arith.constant 1 : i32
    %3 = arith.select %2, %c1_i32, %c16_i32 : i32
    %4 = vector.broadcast %3 : i32 to vector<1x1x256xi32>
    %5 = arith.remsi %1, %4 : vector<1x1x256xi32>
    %c0_i32_2 = arith.constant 0 : i32
    %6 = vector.broadcast %c0_i32_2 : i32 to vector<1x1x256xi32>
    %7 = arith.cmpi ne, %5, %6 : vector<1x1x256xi32>
    %c0_i32_3 = arith.constant 0 : i32
    %8 = vector.broadcast %c0_i32_3 : i32 to vector<1x1x256xi32>
    %9 = arith.cmpi slt, %5, %8 : vector<1x1x256xi32>
    %c0_i32_4 = arith.constant 0 : i32
    %10 = arith.cmpi slt, %3, %c0_i32_4 : i32
    %11 = vector.broadcast %10 : i1 to vector<1x1x256xi1>
    %12 = vector.broadcast %11 : vector<1x1x256xi1> to vector<1x1x256xi1>
    %13 = arith.xori %9, %12 : vector<1x1x256xi1>
    %14 = arith.andi %13, %7 : vector<1x1x256xi1>
    %15 = vector.broadcast %3 : i32 to vector<1x1x256xi32>
    %16 = arith.addi %5, %15 : vector<1x1x256xi32>
    %17 = arith.select %14, %16, %5 : vector<1x1x256xi1>, vector<1x1x256xi32>
    %cst = arith.constant dense<0.000000e+00> : vector<2x3xf32>
    %18 = vector.multi_reduction <add>, %0, %cst [2] : vector<2x3x256xf32> to vector<2x3xf32>
    %19 = vector.extract_strided_slice %0 {offsets = [0, 0, 0], sizes = [2, 3, 16], strides = [1, 1, 1]} : vector<2x3x256xf32> to vector<2x3x16xf32>
    %cst_5 = arith.constant dense<0.000000e+00> : vector<2x3xf32>
    %20 = vector.multi_reduction <add>, %19, %cst_5 [2] : vector<2x3x16xf32> to vector<2x3xf32>
    %21 = vector.extract_strided_slice %0 {offsets = [0, 0, 240], sizes = [2, 3, 16], strides = [1, 1, 1]} : vector<2x3x256xf32> to vector<2x3x16xf32>
    %cst_6 = arith.constant dense<0.000000e+00> : vector<2x3xf32>
    %22 = vector.multi_reduction <add>, %21, %cst_6 [2] : vector<2x3x16xf32> to vector<2x3xf32>
    %c0_i32_7 = arith.constant 0 : i32
    %23 = vector.broadcast %c0_i32_7 : i32 to vector<1x1x256xi32>
    %24 = arith.cmpi eq, %17, %23 : vector<1x1x256xi32>
    %cst_8 = arith.constant 0.000000e+00 : f32
    %25 = vector.shape_cast %24 : vector<1x1x256xi1> to vector<1x1x256xi1>
    %26 = vector.broadcast %25 : vector<1x1x256xi1> to vector<2x3x256xi1>
    %27 = vector.broadcast %cst_8 : f32 to vector<2x3x256xf32>
    %28 = arith.select %26, %0, %27 : vector<2x3x256xi1>, vector<2x3x256xf32>
    %cst_9 = arith.constant dense<0.000000e+00> : vector<2x3xf32>
    %29 = vector.multi_reduction <add>, %28, %cst_9 [2] : vector<2x3x256xf32> to vector<2x3xf32>
    %c15_i32 = arith.constant 15 : i32
    %30 = vector.broadcast %c15_i32 : i32 to vector<1x1x256xi32>
    %31 = arith.cmpi eq, %17, %30 : vector<1x1x256xi32>
    %cst_10 = arith.constant 0.000000e+00 : f32
    %32 = vector.shape_cast %31 : vector<1x1x256xi1> to vector<1x1x256xi1>
    %33 = vector.broadcast %32 : vector<1x1x256xi1> to vector<2x3x256xi1>
    %34 = vector.broadcast %cst_10 : f32 to vector<2x3x256xf32>
    %35 = arith.select %33, %0, %34 : vector<2x3x256xi1>, vector<2x3x256xf32>
    %cst_11 = arith.constant dense<0.000000e+00> : vector<2x3xf32>
    %36 = vector.multi_reduction <add>, %35, %cst_11 [2] : vector<2x3x256xf32> to vector<2x3xf32>
    %37 = vector.extract_strided_slice %0 {offsets = [0, 0, 0], sizes = [2, 3, 1], strides = [1, 1, 1]} : vector<2x3x256xf32> to vector<2x3x1xf32>
    %38 = vector.shape_cast %37 : vector<2x3x1xf32> to vector<2x3xf32>
    %39 = vector.extract_strided_slice %0 {offsets = [0, 0, 15], sizes = [2, 3, 1], strides = [1, 1, 1]} : vector<2x3x256xf32> to vector<2x3x1xf32>
    %40 = vector.shape_cast %39 : vector<2x3x1xf32> to vector<2x3xf32>
    %41 = vector.extract_strided_slice %0 {offsets = [0, 0, 240], sizes = [2, 3, 1], strides = [1, 1, 1]} : vector<2x3x256xf32> to vector<2x3x1xf32>
    %42 = vector.shape_cast %41 : vector<2x3x1xf32> to vector<2x3xf32>
    %43 = vector.extract_strided_slice %0 {offsets = [0, 0, 255], sizes = [2, 3, 1], strides = [1, 1, 1]} : vector<2x3x256xf32> to vector<2x3x1xf32>
    %44 = vector.shape_cast %43 : vector<2x3x1xf32> to vector<2x3xf32>
    %45 = arith.subf %18, %22 : vector<2x3xf32>
    %46 = arith.subf %45, %36 : vector<2x3xf32>
    %47 = arith.addf %46, %44 : vector<2x3xf32>
    %48 = arith.subf %18, %22 : vector<2x3xf32>
    %49 = arith.subf %18, %22 : vector<2x3xf32>
    %50 = arith.subf %49, %29 : vector<2x3xf32>
    %51 = arith.addf %50, %42 : vector<2x3xf32>
    %52 = arith.subf %18, %36 : vector<2x3xf32>
    %53 = arith.subf %18, %29 : vector<2x3xf32>
    %54 = arith.subf %18, %20 : vector<2x3xf32>
    %55 = arith.subf %54, %36 : vector<2x3xf32>
    %56 = arith.addf %55, %40 : vector<2x3xf32>
    %57 = arith.subf %18, %20 : vector<2x3xf32>
    %58 = arith.subf %18, %20 : vector<2x3xf32>
    %59 = arith.subf %58, %29 : vector<2x3xf32>
    %60 = arith.addf %59, %38 : vector<2x3xf32>
    %c0_12 = arith.constant 0 : index
    %c0_13 = arith.constant 0 : index
    %61 = vector.load %arg1[%c0_12, %c0_13] : memref<27x8xf32, #tpu.memory_space<vmem>>, vector<27x8xf32>
    %62 = vector.extract_strided_slice %61 {offsets = [0, 0], sizes = [3, 8], strides = [1, 1]} : vector<27x8xf32> to vector<3x8xf32>
    %cst_14 = arith.constant dense<0.000000e+00> : vector<2x8xf32>
    %63 = tpu.matmul %47, %62, %cst_14 {dimension_numbers = #tpu.dot_dimension_numbers<[1], [0], [0], [1], [0, 0, 1, 1], [], []>} : vector<2x3xf32>, vector<3x8xf32>, vector<2x8xf32> -> vector<2x8xf32>
    %64 = vector.extract_strided_slice %61 {offsets = [3, 0], sizes = [3, 8], strides = [1, 1]} : vector<27x8xf32> to vector<3x8xf32>
    %cst_15 = arith.constant dense<0.000000e+00> : vector<2x8xf32>
    %65 = tpu.matmul %48, %64, %cst_15 {dimension_numbers = #tpu.dot_dimension_numbers<[1], [0], [0], [1], [0, 0, 1, 1], [], []>} : vector<2x3xf32>, vector<3x8xf32>, vector<2x8xf32> -> vector<2x8xf32>
    %66 = vector.extract_strided_slice %61 {offsets = [6, 0], sizes = [3, 8], strides = [1, 1]} : vector<27x8xf32> to vector<3x8xf32>
    %cst_16 = arith.constant dense<0.000000e+00> : vector<2x8xf32>
    %67 = tpu.matmul %51, %66, %cst_16 {dimension_numbers = #tpu.dot_dimension_numbers<[1], [0], [0], [1], [0, 0, 1, 1], [], []>} : vector<2x3xf32>, vector<3x8xf32>, vector<2x8xf32> -> vector<2x8xf32>
    %68 = vector.extract_strided_slice %61 {offsets = [9, 0], sizes = [3, 8], strides = [1, 1]} : vector<27x8xf32> to vector<3x8xf32>
    %cst_17 = arith.constant dense<0.000000e+00> : vector<2x8xf32>
    %69 = tpu.matmul %52, %68, %cst_17 {dimension_numbers = #tpu.dot_dimension_numbers<[1], [0], [0], [1], [0, 0, 1, 1], [], []>} : vector<2x3xf32>, vector<3x8xf32>, vector<2x8xf32> -> vector<2x8xf32>
    %70 = vector.extract_strided_slice %61 {offsets = [12, 0], sizes = [3, 8], strides = [1, 1]} : vector<27x8xf32> to vector<3x8xf32>
    %cst_18 = arith.constant dense<0.000000e+00> : vector<2x8xf32>
    %71 = tpu.matmul %18, %70, %cst_18 {dimension_numbers = #tpu.dot_dimension_numbers<[1], [0], [0], [1], [0, 0, 1, 1], [], []>} : vector<2x3xf32>, vector<3x8xf32>, vector<2x8xf32> -> vector<2x8xf32>
    %72 = vector.extract_strided_slice %61 {offsets = [15, 0], sizes = [3, 8], strides = [1, 1]} : vector<27x8xf32> to vector<3x8xf32>
    %cst_19 = arith.constant dense<0.000000e+00> : vector<2x8xf32>
    %73 = tpu.matmul %53, %72, %cst_19 {dimension_numbers = #tpu.dot_dimension_numbers<[1], [0], [0], [1], [0, 0, 1, 1], [], []>} : vector<2x3xf32>, vector<3x8xf32>, vector<2x8xf32> -> vector<2x8xf32>
    %74 = vector.extract_strided_slice %61 {offsets = [18, 0], sizes = [3, 8], strides = [1, 1]} : vector<27x8xf32> to vector<3x8xf32>
    %cst_20 = arith.constant dense<0.000000e+00> : vector<2x8xf32>
    %75 = tpu.matmul %56, %74, %cst_20 {dimension_numbers = #tpu.dot_dimension_numbers<[1], [0], [0], [1], [0, 0, 1, 1], [], []>} : vector<2x3xf32>, vector<3x8xf32>, vector<2x8xf32> -> vector<2x8xf32>
    %76 = vector.extract_strided_slice %61 {offsets = [21, 0], sizes = [3, 8], strides = [1, 1]} : vector<27x8xf32> to vector<3x8xf32>
    %cst_21 = arith.constant dense<0.000000e+00> : vector<2x8xf32>
    %77 = tpu.matmul %57, %76, %cst_21 {dimension_numbers = #tpu.dot_dimension_numbers<[1], [0], [0], [1], [0, 0, 1, 1], [], []>} : vector<2x3xf32>, vector<3x8xf32>, vector<2x8xf32> -> vector<2x8xf32>
    %78 = vector.extract_strided_slice %61 {offsets = [24, 0], sizes = [3, 8], strides = [1, 1]} : vector<27x8xf32> to vector<3x8xf32>
    %cst_22 = arith.constant dense<0.000000e+00> : vector<2x8xf32>
    %79 = tpu.matmul %60, %78, %cst_22 {dimension_numbers = #tpu.dot_dimension_numbers<[1], [0], [0], [1], [0, 0, 1, 1], [], []>} : vector<2x3xf32>, vector<3x8xf32>, vector<2x8xf32> -> vector<2x8xf32>
    %80 = arith.addf %63, %65 : vector<2x8xf32>
    %81 = arith.addf %67, %69 : vector<2x8xf32>
    %82 = arith.addf %71, %73 : vector<2x8xf32>
    %83 = arith.addf %75, %77 : vector<2x8xf32>
    %84 = arith.addf %80, %81 : vector<2x8xf32>
    %85 = arith.addf %82, %83 : vector<2x8xf32>
    %86 = arith.addf %84, %85 : vector<2x8xf32>
    %87 = arith.addf %86, %79 : vector<2x8xf32>
    %cst_23 = arith.constant 3.906250e-03 : f32
    %88 = vector.broadcast %cst_23 : f32 to vector<2x8xf32>
    %89 = arith.mulf %87, %88 : vector<2x8xf32>
    %c0_24 = arith.constant 0 : index
    %c0_25 = arith.constant 0 : index
    %90 = vector.load %arg2[%c0_24, %c0_25] : memref<1x8xf32, #tpu.memory_space<vmem>>, vector<1x8xf32>
    %91 = vector.broadcast %90 : vector<1x8xf32> to vector<2x8xf32>
    %92 = arith.addf %89, %91 : vector<2x8xf32>
    %cst_26 = arith.constant 0.000000e+00 : f32
    %93 = vector.broadcast %cst_26 : f32 to vector<2x8xf32>
    %94 = arith.maximumf %92, %93 : vector<2x8xf32>
    %c0_27 = arith.constant 0 : index
    %c0_28 = arith.constant 0 : index
    %95 = vector.load %arg3[%c0_27, %c0_28] : memref<2x8xf32, #tpu.memory_space<vmem>>, vector<2x8xf32>
    tpu.vector_store %arg3[%c0_27, %c0_28], %94 {strides = array<i32>} : memref<2x8xf32, #tpu.memory_space<vmem>>, vector<2x8xf32>,
    return
  }
}

</mosaic_0001>

<bundles_post_ra>
// kernel: tpu_custom_call.1
= control target key start
LH: loop header
LB: loop body
LE: loop exit
PB: predicated region body
PF: predicated region fallthrough
CT: control target
= control target key end

     0   :  { %vm50_vm0 = vcmask 1042432   ;;  %v17_v2 = vlaneseq  ;;  %s1371_s0 = inlined_call_operand.vmem [shape: f32[2,3,256], index: 0, kind: input, shape index: {}]   ;;  %s1372_s1 = inlined_call_operand.vmem [shape: f32[27,8], index: 1, kind: input, shape index: {}]   ;;  %s1373_s2 = inlined_call_operand.vmem [shape: f32[1,8], index: 2, kind: input, shape index: {}]   ;;  %s1374_s3 = inlined_call_operand.hbm [shape: f32[2,8], index: 3, kind: output, shape index: {}]  }
   0x1   :  { %v1153_v0 = vld [vmem:[%s1371_s0] sm:$0x77]  ;;  %v1158_v1 = vld [vmem:[%s1371_s0 + $0x8] sm:$0x77] }
   0x2   :  { %v46_v3 = vcombine.high %v1153_v0, %v1153_v0  ;;  %v47_v4 = vcombine.high %v1158_v1, %v1158_v1  ;;  %v51_v5 = vsel %vm50_vm0, %v1153_v0, 0.0 }
   0x3   :  { %8 = vsyncpa [#allocation3], 0  ;;  %v18_v6 = vand.u32 127, %v17_v2  ;;  %v173_v7 = vshrl.u32 %v17_v2, 7  ;;  %s1123_s16 = smov 16   ;;  %v56_v9 = vsel %vm50_vm0, %v1158_v1, 0.0 }
   0x4   :  { %68 = vrot.lane.b32.xlu0 %v46_v3, %s1123_s16  ;;  %v52_v8 = vsel %vm50_vm0, %v46_v3, 0.0  ;;  %v57_v10 = vsel %vm50_vm0, %v47_v4, 0.0  ;;  %vm61_vm2 = vcmask 124928   ;;  %v1217_v42 = vld [vmem:[%s1372_s1 + $0x8] sm:$0xff]  ;;  %v1124_v43 = vmov 0.0   ;;  %s1126_s18 = smov 1  }
   0x5   :  { %v53_v11 = vadd.f32 %v52_v8, %v51_v5  ;;  %v19_v12 = vadd.s32 128, %v18_v6  ;;  %v24_v13 = vand.u32 15, %v18_v6  ;;  %v1171_v14 = vsub.s32 %v18_v6, %v173_v7  ;;  %1050 = vmatprep.subr.mxu1 %v1124_v43  ;;  %1045 = vmatprep.subr.mxu0 %v1124_v43  ;;  %s1128_s19 = smov 113   ;;  %v1240_v50 = vld [vmem:[%s1372_s1] sm:$0xff]  ;;  %v1269_v63 = vld [vmem:[%s1372_s1 + $0x10] sm:$0xff]  ;;  %s1129_s27 = smov [#allocation2]  }
   0x6   :  { %v58_v15 = vadd.f32 %v57_v10, %v56_v9  ;;  %v65_v20 = vsel %vm61_vm2, %v1158_v1, 0.0  ;;  %v62_v41 = vsel %vm61_vm2, %v1153_v0, 0.0  ;;  %v271_v44 = vrot.slane %v1217_v42, 1  ;;  %s1000_s28 = sshll.u32 %s1129_s27, 4  ;;  %s1001_s28 = int_to_ptr.vmem [resolvable:$true] %s1000_s28 }
   0x7   :  { %54 = vadd.xlane.f32.xlu1 %v53_v11  ;;  %v31_v16 = vand.u32 15, %v19_v12  ;;  %vm1173_vm1 = vcmp.eq.s32.totalorder %v24_v13, 0  ;;  %vm1188_vm4 = vcmp.eq.s32.totalorder %v24_v13, 15  ;;  %vm1125_vm6 = vmmov 0   ;;  %s1101_s29 = scalar_lea.vmem %s1001_s28, 32  ;;  %p1106_p1 = scmp.lt.s32.totalorder %s1001_s28, %s1001_s28 }
   0x8   :  { %70 = vrot.lane.b32.xlu0 %v47_v4, %s1123_s16  ;;  %v86_v18 = vsel %vm1173_vm1, %v1153_v0, 0.0  ;;  %v88_v23 = vsel %vm1173_vm1, %v1158_v1, 0.0  ;;  %v106_v30 = vsel %vm1188_vm4, %v1153_v0, 0.0  ;;  %v108_v35 = vsel %vm1188_vm4, %v1158_v1, 0.0  ;;  %1052 = vmatprep.mubr.msk.f32.mxu1 %vm1125_vm6, %v1124_v43  ;;  %p1102_p0 = scmp.ne.s32.totalorder %s1001_s28, %s1101_s29  ;;  %p1107_p2 = scmp.lt.s32.totalorder %s1101_s29, %s1101_s29 }
   0x9   :  { %vm81_vm3 = vcmp.eq.s32.totalorder %v31_v16, 0  ;;  %v90_v21 = vsel %vm50_vm0, %v86_v18, 0.0  ;;  %vm1192_vm5 = vcmp.eq.s32.totalorder %v31_v16, 15  ;;  %v95_v28 = vsel %vm50_vm0, %v88_v23, 0.0  ;;  %1047 = vmatprep.mubr.msk.f32.mxu0 %vm1125_vm6, %v1124_v43  ;;  %1051 = vmatpush3.msk.msra.mxu1 %vm50_vm0, %v271_v44 }
   0xa   :  { %v87_v19 = vsel %vm81_vm3, %v46_v3, 0.0  ;;  %v89_v24 = vsel %vm81_vm3, %v47_v4, 0.0  ;;  %v107_v31 = vsel %vm1192_vm5, %v46_v3, 0.0  ;;  %v110_v33 = vsel %vm50_vm0, %v106_v30, 0.0  ;;  %1060 = vmatprep.subr.mxu1 %v1124_v43  ;;  %p1108_p3 = por %p1107_p2, %p1106_p1 }
   0xb   :  { %59 = vadd.xlane.f32.xlu1 %v58_v15  ;;  %v91_v22 = vsel %vm50_vm0, %v87_v19, 0.0  ;;  %v96_v29 = vsel %vm50_vm0, %v89_v24, 0.0  ;;  %v111_v34 = vsel %vm50_vm0, %v107_v31, 0.0  ;;  %v109_v36 = vsel %vm1192_vm5, %v47_v4, 0.0 }
   0xc   :  { %v92_v27 = vadd.f32 %v91_v22, %v90_v21  ;;  %v97_v32 = vadd.f32 %v96_v29, %v95_v28  ;;  %v112_v37 = vadd.f32 %v111_v34, %v110_v33  ;;  %v115_v38 = vsel %vm50_vm0, %v108_v35, 0.0  ;;  %p1109_p4 = pnand %p1108_p3, %p1102_p0 }
   0xd   :  { %v116_v39 = vsel %vm50_vm0, %v109_v36, 0.0  ;;  %v1127_v45 = vmov 0   ;;  %v183_v51 = vrot.slane %v1240_v50, 3  ;;  %vm180_vm7 = vcmask 1041409  }
   0xe   :  { %v117_v40 = vadd.f32 %v116_v39, %v115_v38  ;;  %1098 = vset.pattern.permute.xlu1 %v1127_v45  ;;  %1097 = vset.pattern.permute.xlu0 %v1127_v45  ;;  %vm184_vm8 = vcmask 23552   ;;  %v447_v4 = vrot.slane %v1269_v63, 5  ;;  %v359_v24 = vrot.slane %v1217_v42, 7 }
   0xf   :  { %66 = vadd.xlane.f32.xlu1 %v65_v20  ;;  %1046 = vmatpush3.msk.msra.mxu0 %vm50_vm0, %v183_v51  ;;  %v360_v25 = vrot.slane %v1269_v63, 7  ;;  %vm358_vm9 = vcmask 1040384   ;;  %vm722_vm10 = vcmask 1041408   ;;  %vm992_vm11 = vcmask 58368  }
  0x10   :  { %1055 = vmatprep.subr.mxu0 %v1124_v43 }
  0x13   :  { %93 = vadd.xlane.f32.xlu1 %v92_v27 }
  0x17   :  { %98 = vadd.xlane.f32.xlu1 %v97_v32 }
  0x1b   :  { %113 = vadd.xlane.f32.xlu1 %v112_v37  ;;  %v361_v37 = vsel %vm358_vm9, %v359_v24, %v360_v25 }
  0x1f   :  { %118 = vadd.xlane.f32.xlu1 %v117_v40 }
  0x27   :  { %63 = vadd.xlane.f32.xlu0 %v62_v41 }
  0x30   :  { %120 = vrot.lane.b32.xlu1 %v1153_v0, %s1123_s16 }
  0x34   :  { %128 = vrot.lane.b32.xlu1 %v1153_v0, %s1126_s18 }
  0x38   :  { %130 = vrot.lane.b32.xlu1 %v1158_v1, %s1126_s18 }
  0x3d   :  { %122 = vrot.lane.b32.xlu0 %v1158_v1, %s1123_s16 }
  0x41   :  { %154 = vrot.lane.b32.xlu0 %v1153_v0, %s1128_s19 }
  0x76   :  { %v69_v46 = vpop.permute.xlu0 %68 }
  0x77   :  { %v74_v47 = vsel %vm61_vm2, %v69_v46, 0.0 }
  0x78   :  { %75 = vadd.xlane.f32.xlu1 %v74_v47 }
  0x7a   :  { %v71_v48 = vpop.permute.xlu0 %70 }
  0x7b   :  { %v77_v49 = vsel %vm61_vm2, %v71_v48, 0.0 }
  0x7c   :  { %78 = vadd.xlane.f32.xlu1 %v77_v49  ;;  %v169_v49 = vld [vmem:[%s1372_s1 + $0x18] sm:$0x7] }
  0x8d   :  { %156 = vrot.lane.b32.xlu1 %v1158_v1, %s1128_s19 }
  0x90   :  { %v1246_v52 = vpop.xlane.xlu1 %54 }
  0x94   :  { %v1248_v53 = vpop.xlane.xlu1 %59 }
  0x98   :  { %v67_v54 = vpop.xlane.xlu1 %66 }
  0x99   :  { %v1253_v56 = vsub.f32 %v1248_v53, %v67_v54 }
  0x9b   :  { %v445_v7 = vrot.slane %v1253_v56, %v1171_v14 }
  0x9c   :  { %v1250_v55 = vpop.xlane.xlu1 %93 }
  0x9d   :  { %v148_v20 = vsub.f32 %v1246_v52, %v1250_v55 }
  0x9f   :  { %v351_v34 = vrot.slane %v148_v20, %v1171_v14 }
  0xa0   :  { %v1255_v57 = vpop.xlane.xlu1 %98 }
  0xa1   :  { %v163_v58 = vsub.f32 %v1253_v56, %v1255_v57  ;;  %v149_v21 = vsub.f32 %v1248_v53, %v1255_v57 }
  0xa3   :  { %v165_v59 = vadd.f32 %v163_v58, %v1158_v1  ;;  %v355_v35 = vrot.slane %v149_v21, %v1171_v14  ;;  %v723_v58 = vrot.slane %v1240_v50, 6 }
  0xa4   :  { %v1260_v60 = vpop.xlane.xlu1 %113 }
  0xa5   :  { %v146_v61 = vsub.f32 %v1246_v52, %v1260_v60  ;;  %528 = vperm.xlu1 %1098, %v165_v59   ;;  %v356_v47 = vsel %vm180_vm7, %v355_v35, %v351_v34  ;;  %v724_v59 = vrot.slane %v1217_v42, 6 }
  0xa7   :  { %v264_v2 = vrot.slane %v146_v61, %v1171_v14 }
  0xa8   :  { %v1264_v62 = vpop.xlane.xlu1 %118 }
  0xa9   :  { %v147_v3 = vsub.f32 %v1248_v53, %v1264_v62  ;;  %v153_v54 = vsub.f32 %v1253_v56, %v1264_v62 }
  0xab   :  { %v268_v1 = vrot.slane %v147_v3, %v1171_v14 }
  0xac   :  { %v121_v13 = vpop.permute.xlu1 %120 }
  0xad   :  { %v269_v5 = vsel %vm180_vm7, %v268_v1, %v264_v2  ;;  %v124_v29 = vrot.slane %v121_v13, 4 }
  0xae   :  { %1053 = vmatmul.mubr.msk.f32.vlgmr.msra.gmra.mxu1 %vm184_vm8, %v269_v5 }
  0xaf   :  { %1061 = vmatpush3.msk.msra.mxu1 %vm50_vm0, %v447_v4  ;;  %1062 = vmatprep.mubr.msk.f32.mxu1 %vm1125_vm6, %v1124_v43 }
  0xb0   :  { %v64_v6 = vpop.xlane.xlu0 %63  ;;  %1070 = vmatprep.subr.mxu1 %v1124_v43  ;;  %v129_v15 = vpop.permute.xlu1 %128 }
  0xb1   :  { %v150_v8 = vsub.f32 %v1246_v52, %v64_v6  ;;  %v132_v19 = vrot.slane %v129_v15, 4 }
  0xb3   :  { %v162_v9 = vsub.f32 %v150_v8, %v1250_v55  ;;  %v441_v10 = vrot.slane %v150_v8, %v1171_v14  ;;  %v152_v45 = vsub.f32 %v150_v8, %v1260_v60 }
  0xb4   :  { %v131_v16 = vpop.permute.xlu1 %130  ;;  %v123_v22 = vpop.permute.xlu0 %122 }
  0xb5   :  { %v446_v11 = vsel %vm180_vm7, %v445_v7, %v441_v10  ;;  %v164_v12 = vadd.f32 %v162_v9, %v1153_v0  ;;  %v133_v30 = vrot.slane %v131_v16, 4  ;;  %v125_v36 = vrot.slane %v123_v22, 4 }
  0xb6   :  { %1063 = vmatmul.mubr.msk.f32.vlgmr.msra.gmra.mxu1 %vm184_vm8, %v446_v11  ;;  %v811_v10 = vrot.slane %v1217_v42, 4  ;;  %v805_v11 = vrot.slane %v1246_v52, %v1171_v14  ;;  %v903_v42 = vrot.slane %v1269_v63, 2 }
  0xb7   :  { %525 = vperm.xlu0 %1097, %v164_v12   ;;  %1071 = vmatpush3.msk.msra.mxu1 %vm50_vm0, %v1240_v50  ;;  %v809_v12 = vrot.slane %v1248_v53, %v1171_v14 }
  0xb8   :  { %1072 = vmatprep.mubr.msk.f32.mxu1 %vm1125_vm6, %v1124_v43  ;;  %1080 = vmatprep.subr.mxu1 %v1124_v43  ;;  %v155_v44 = vpop.permute.xlu0 %154 }
  0xb9   :  { %v160_v46 = vadd.f32 %v155_v44, %v152_v45 }
 0x101   :  { %v76_v17 = vpop.xlane.xlu1 %75 }
 0x102   :  { %v136_v18 = vsub.f32 %v1246_v52, %v76_v17 }
 0x104   :  { %v138_v0 = vsub.f32 %v136_v18, %v1260_v60  ;;  %v142_v26 = vsub.f32 %v136_v18, %v1250_v55  ;;  %v175_v31 = vrot.slane %v136_v18, %v1171_v14 }
 0x105   :  { %v79_v23 = vpop.xlane.xlu1 %78 }
 0x106   :  { %v137_v27 = vsub.f32 %v1248_v53, %v79_v23  ;;  %v140_v28 = vadd.f32 %v138_v0, %v132_v19  ;;  %v144_v40 = vadd.f32 %v142_v26, %v124_v29  ;;  %v810_v53 = vsel %vm180_vm7, %v809_v12, %v805_v11 }
 0x108   :  { %v139_v32 = vsub.f32 %v137_v27, %v1264_v62  ;;  %v179_v33 = vrot.slane %v137_v27, %v1171_v14  ;;  %617 = vperm.xlu1 %1098, %v140_v28   ;;  %v143_v38 = vsub.f32 %v137_v27, %v1255_v57  ;;  %v725_v62 = vsel %vm722_vm10, %v723_v58, %v724_v59 }
 0x109   :  { %v157_v51 = vpop.permute.xlu1 %156 }
 0x10a   :  { %v181_v39 = vsel %vm180_vm7, %v179_v33, %v175_v31  ;;  %v141_v41 = vadd.f32 %v139_v32, %v133_v30  ;;  %v145_v48 = vadd.f32 %v143_v38, %v125_v36  ;;  %v161_v55 = vadd.f32 %v157_v51, %v153_v54 }
 0x10b   :  { %1048 = vmatmul.mubr.msk.f32.vlgmr.msra.gmra.mxu0 %vm184_vm8, %v181_v39 }
 0x10c   :  { %708 = vperm.xlu1 %1098, %v144_v40   ;;  %620 = vperm.xlu0 %1097, %v141_v41   ;;  %v1026_v41 = vld [vmem:[%s1373_s2] ss:$0 sm:$0xff] }
 0x10d   :  { %1056 = vmatpush3.msk.msra.mxu0 %vm50_vm0, %v361_v37  ;;  %1057 = vmatprep.mubr.msk.f32.mxu0 %vm1125_vm6, %v1124_v43 }
 0x10e   :  { %1065 = vmatprep.subr.mxu0 %v1124_v43 }
 0x10f   :  { %1058 = vmatmul.mubr.msk.f32.vlgmr.msra.gmra.mxu0 %vm184_vm8, %v356_v47 }
 0x110   :  { %889 = vperm.xlu1 %1098, %v160_v46   ;;  %711 = vperm.xlu0 %1097, %v145_v48  }
 0x111   :  { %1066 = vmatpush3.msk.msra.mxu0 %vm50_vm0, %v169_v49  ;;  %1067 = vmatprep.mubr.msk.f32.mxu0 %vm1125_vm6, %v1124_v43 }
 0x112   :  { %1075 = vmatprep.subr.mxu0 %v1124_v43 }
 0x114   :  { %892 = vperm.xlu0 %1097, %v161_v55  }
 0x120   :  { %v529_v57 = vpop.permute.xlu1 %528 }
 0x121   :  { %v537_v60 = vrot.slane %v529_v57, %v1171_v14 }
 0x132   :  { %v526_v56 = vpop.permute.xlu0 %525 }
 0x133   :  { %v533_v61 = vrot.slane %v526_v56, %v1171_v14 }
 0x135   :  { %v538_v2 = vsel %vm180_vm7, %v537_v60, %v533_v61 }
 0x136   :  { %1068 = vmatmul.mubr.msk.f32.vlgmr.msra.gmra.mxu0 %vm184_vm8, %v538_v2 }
 0x137   :  { %1076 = vmatpush3.msk.msra.mxu0 %vm50_vm0, %v725_v62  ;;  %1077 = vmatprep.mubr.msk.f32.mxu0 %vm1125_vm6, %v1124_v43 }
 0x138   :  { %1085 = vmatprep.subr.mxu0 %v1124_v43 }
 0x16e   :  { %v342_v50 = vpop.f32.mrf.mxu1 }
 0x170   :  { %v1054_v3 = vpop.f32.mrf.mxu1 }
 0x176   :  { %v518_v1 = vpop.f32.mrf.mxu1 }
 0x178   :  { %v1064_v4 = vpop.f32.mrf.mxu1 }
 0x183   :  { %v618_v5 = vpop.permute.xlu1 %617 }
 0x184   :  { %v625_v8 = vrot.slane %v618_v5, %v1171_v14 }
 0x187   :  { %v621_v6 = vpop.permute.xlu0 %620  ;;  %v709_v7 = vpop.permute.xlu1 %708 }
 0x188   :  { %v629_v9 = vrot.slane %v621_v6, %v1171_v14  ;;  %v716_v16 = vrot.slane %v709_v7, %v1171_v14 }
 0x18a   :  { %v630_v13 = vsel %vm180_vm7, %v629_v9, %v625_v8 }
 0x18b   :  { %v712_v15 = vpop.permute.xlu0 %711  ;;  %1073 = vmatmul.mubr.msk.f32.vlgmr.msra.gmra.mxu1 %vm184_vm8, %v630_v13  ;;  %v890_v52 = vpop.permute.xlu1 %889 }
 0x18c   :  { %v720_v17 = vrot.slane %v712_v15, %v1171_v14  ;;  %1081 = vmatpush3.msk.msra.mxu1 %vm50_vm0, %v811_v10  ;;  %1082 = vmatprep.mubr.msk.f32.mxu1 %vm1125_vm6, %v1124_v43  ;;  %v897_v0 = vrot.slane %v890_v52, %v1171_v14 }
 0x18e   :  { %v721_v18 = vsel %vm180_vm7, %v720_v17, %v716_v16 }
 0x18f   :  { %v893_v19 = vpop.permute.xlu0 %892  ;;  %1078 = vmatmul.mubr.msk.f32.vlgmr.msra.gmra.mxu0 %vm184_vm8, %v721_v18  ;;  %1083 = vmatmul.mubr.msk.f32.vlgmr.msra.gmra.mxu1 %vm184_vm8, %v810_v53 }
 0x190   :  { %v901_v20 = vrot.slane %v893_v19, %v1171_v14  ;;  %1086 = vmatpush3.msk.msra.mxu0 %vm50_vm0, %v903_v42  ;;  %1087 = vmatprep.mubr.msk.f32.mxu0 %vm1125_vm6, %v1124_v43 }
 0x192   :  { %v902_v63 = vsel %vm180_vm7, %v901_v20, %v897_v0 }
 0x193   :  { %1088 = vmatmul.mubr.msk.f32.vlgmr.msra.gmra.mxu0 %vm184_vm8, %v902_v63 }
 0x1cb   :  { %v255_v21 = vpop.f32.mrf.mxu0 }
 0x1cd   :  { %v1049_v22 = vpop.f32.mrf.mxu0 }
 0x1cf   :  { %v432_v23 = vpop.f32.mrf.mxu0 }
 0x1d1   :  { %v1059_v24 = vpop.f32.mrf.mxu0 }
 0x1f6   :  { %v610_v25 = vpop.f32.mrf.mxu0 }
 0x1f8   :  { %v1069_v26 = vpop.f32.mrf.mxu0 }
 0x24b   :  { %v701_v27 = vpop.f32.mrf.mxu1 }
 0x24c   :  { %v702_v34 = vadd.f32 %v701_v27, %v255_v21 }
 0x24d   :  { %v1074_v28 = vpop.f32.mrf.mxu1 }
 0x24f   :  { %v796_v29 = vpop.f32.mrf.mxu0  ;;  %v882_v30 = vpop.f32.mrf.mxu1 }
 0x250   :  { %v797_v32 = vadd.f32 %v796_v29, %v342_v50  ;;  %v883_v43 = vadd.f32 %v882_v30, %v432_v23 }
 0x251   :  { %v1079_v14 = vpop.f32.mrf.mxu0  ;;  %v1084_v31 = vpop.f32.mrf.mxu1 }
 0x252   :  { %v978_v37 = vadd.f32 %v797_v32, %v702_v34 }
 0x253   :  { %v974_v33 = vpop.f32.mrf.mxu0 }
 0x254   :  { %v975_v35 = vadd.f32 %v974_v33, %v518_v1 }
 0x255   :  { %v1089_v36 = vpop.f32.mrf.mxu0 }
 0x256   :  { %v979_v38 = vadd.f32 %v975_v35, %v883_v43 }
 0x258   :  { %v980_v39 = vadd.f32 %v979_v38, %v978_v37 }
 0x25a   :  { %v981_v40 = vadd.f32 %v980_v39, %v610_v25 }
 0x25c   :  { %v982_v44 = vmul.f32 0.00390625, %v981_v40 }
 0x25e   :  { %v990_v45 = vadd.f32 %v1026_v41, %v982_v44 }
 0x260   :  { %v991_v46 = vmax.f32 %v990_v45, 0.0 }
 0x262   :  { %993 = vst.msk [vmem:[#allocation2] sm:$0x3] %vm992_vm11, %v991_v46 }
 0x263   :  { %1112 = shalt.err (!%p1109_p4)
}
 0x264   :  { %1003 = dma.vmem_to_hbm [thread:$0]  %s1001_s28, 32, %s1374_s3, [#allocation3]  }
 0x265   :  { %1121 = dma.done.wait [#allocation3], 32  }
 0x266   :  { %1122 = vsyncadd [#allocation3], 4294967264 }
 0x267   :  { %1007 = vsyncpa [#allocation3], 1 }

</bundles_post_ra>
